<compile_context>
chip_gen: v5e
topology: v5e:2x2
jax: 0.10.0
libtpu: 0.0.40
codegen_flags: <defaults>
</compile_context>

<pallas_src>
import functools

import jax
import jax.numpy as jnp
from jax.experimental import pallas as pl
from jax.experimental.pallas import tpu as pltpu

_LANE = 128
_BLOCK_BUDGET_BYTES = 4 * 1024 * 1024  # target in+out bytes per grid step (pre double-buffer)


def _largest_divisor_leq(n, cap):
    """Largest divisor of n that is <= cap (at least 1)."""
    cap = max(1, min(n, cap))
    for d in range(cap, 0, -1):
        if n % d == 0:
            return d
    return 1


def _make_temporal_pool_kernel(T, T_out, kernel_size, stride, pad, mode):
    """Builds the kernel body.

    Block shapes:
      x_ref: (Bn, T, TF)      -- Bn batch elements, all input frames, one feature tile
      o_ref: (Bn, T_out, TF)  -- same batch elements, all output frames, same feature tile
    """
    # Valid taps per output row, computed at trace time.
    taps_per_row = []
    for to in range(T_out):
        taps = [to * stride - pad + kk for kk in range(kernel_size)]
        taps_per_row.append([ti for ti in taps if 0 <= ti < T])

    inv_k = 1.0 / kernel_size

    def kernel(x_ref, o_ref):
        for to, taps in enumerate(taps_per_row):
            if mode == "avg":
                # count_include_pad=True: padded zeros contribute 0, divisor is always k.
                acc = x_ref[:, taps[0], :].astype(jnp.float32)
                for ti in taps[1:]:
                    acc = acc + x_ref[:, ti, :].astype(jnp.float32)
                o_ref[:, to, :] = (acc * inv_k).astype(o_ref.dtype)
            else:  # 'max': padded positions (conceptually -inf) never win -> skip them
                r = x_ref[:, taps[0], :]
                for ti in taps[1:]:
                    r = jnp.maximum(r, x_ref[:, ti, :])
                o_ref[:, to, :] = r.astype(o_ref.dtype)

    return kernel


@functools.partial(jax.jit, static_argnames=("frames", "kernel_size", "stride", "mode"))
def temporal_pooling(x, frames, kernel_size=3, stride=2, mode="avg"):
    """Pallas implementation of TemporalPooling.forward.

    x: (nt, c, h, w) with nt = n * frames. Returns (n * t_out, c, h, w).
    """
    nt, c, h, w = x.shape
    assert nt % frames == 0, "nt must be a multiple of frames"
    n = nt // frames
    T = frames
    pad = (kernel_size - 1) // stride  # matches PyTorch module's pad_size formula
    T_out = (T + 2 * pad - kernel_size) // stride + 1
    F = c * h * w
    itemsize = jnp.dtype(x.dtype).itemsize

    # Glue: flatten per-frame features; pooling is elementwise over them.
    xr = x.reshape(n, T, F)

    # --- tile selection: lane-dense feature tile + multi-batch blocks (~4 MiB / step) ---
    row_bytes = (T + T_out) * itemsize  # in+out bytes per lane element per batch element
    if F % _LANE == 0:
        m = F // _LANE
        cap_d = max(1, _BLOCK_BUDGET_BYTES // (row_bytes * _LANE))
        d = _largest_divisor_leq(m, cap_d)
        TF = d * _LANE  # largest multiple-of-128 divisor of F fitting the block budget
    else:
        # TODO(synk): F not a multiple of 128 -> full-F block (correct, but masked lane stores).
        TF = F
    n_ftiles = F // TF

    per_batch_block_bytes = row_bytes * TF
    cap_bn = max(1, _BLOCK_BUDGET_BYTES // per_batch_block_bytes)
    Bn = _largest_divisor_leq(n, cap_bn)
    n_btiles = n // Bn

    in_block_bytes = Bn * T * TF * itemsize
    out_block_bytes = Bn * T_out * TF * itemsize
    # Double-buffered in/out pair plus slack; safe on all generations (<= 64 MiB).
    vmem_limit = max(32 * 1024 * 1024, 2 * (in_block_bytes + out_block_bytes) + (4 << 20))

    kernel = _make_temporal_pool_kernel(T, T_out, kernel_size, stride, pad, mode)

    cost = pl.CostEstimate(
        flops=n * T_out * F * kernel_size,
        transcendentals=0,
        bytes_accessed=(n * T * F + n * T_out * F) * itemsize,
    )

    out = pl.pallas_call(
        kernel,
        out_shape=jax.ShapeDtypeStruct((n, T_out, F), x.dtype),
        grid=(n_btiles, n_ftiles),
        in_specs=[pl.BlockSpec((Bn, T, TF), lambda i, j: (i, 0, j))],
        out_specs=pl.BlockSpec((Bn, T_out, TF), lambda i, j: (i, 0, j)),
        compiler_params=pltpu.CompilerParams(
            dimension_semantics=("parallel", "parallel"),
            vmem_limit_bytes=vmem_limit,
        ),
        cost_estimate=cost,
    )(xr)

    return out.reshape(n * T_out, c, h, w)


def _reference_temporal_pooling(x, frames, kernel_size=3, stride=2, mode="avg"):
    """Pure-JAX reference matching PyTorch AvgPool3d/MaxPool3d semantics."""
    nt, c, h, w = x.shape
    n = nt // frames
    T = frames
    pad = (kernel_size - 1) // stride
    T_out = (T + 2 * pad - kernel_size) // stride + 1
    xr = x.reshape(n, T, c, h, w).astype(jnp.float32)

    outs = []
    for to in range(T_out):
        taps = []
        for kk in range(kernel_size):
            ti = to * stride - pad + kk
            if 0 <= ti < T:
                taps.append(xr[:, ti])
        if mode == "avg":
            s = sum(taps)  # padded zeros contribute 0
            outs.append(s / kernel_size)  # count_include_pad=True
        else:
            r = taps[0]
            for t in taps[1:]:
                r = jnp.maximum(r, t)
            outs.append(r)
    out = jnp.stack(outs, axis=1)  # (n, T_out, c, h, w)
    return out.reshape(n * T_out, c, h, w).astype(x.dtype)


if __name__ == "__main__":
    # TemporalPooling has no learnable parameters (pure pooling module).
    frames = 8
    n_clips = 2
    c, h, w = 4, 16, 16
    nt = n_clips * frames

    key = jax.random.PRNGKey(0)
    x = jax.random.normal(key, (nt, c, h, w), dtype=jnp.float32)

    ok = True
    for mode in ("avg", "max"):
        y = temporal_pooling(x, frames, kernel_size=3, stride=2, mode=mode)
        jax.block_until_ready(y)
        y_ref = _reference_temporal_pooling(x, frames, kernel_size=3, stride=2, mode=mode)
        if y.shape != y_ref.shape or not bool(
            jnp.allclose(y, y_ref, atol=1e-5, rtol=1e-5)
        ):
            ok = False
            print(f"MISMATCH in mode={mode}")

    if ok:
        print("KERNEL_OK")
</pallas_src>

<mosaic_0001>
module attributes {stable_mosaic.version = 11 : i64} {
  func.func @kernel(%arg0: i32, %arg1: i32, %arg2: memref<2x8x1024xf32, #tpu.memory_space<vmem>>, %arg3: memref<2x4x1024xf32, #tpu.memory_space<vmem>>) attributes {dimension_semantics = [#tpu.dimension_semantics<parallel>, #tpu.dimension_semantics<parallel>], iteration_bounds = array<i64: 1, 1>, scalar_prefetch = 0 : i64, scratch_operands = 0 : i64, tpu.core_type = #tpu.core_type<tc>, window_params = [{transform_indices = @transform_0, window_bounds = array<i64: 2, 8, 1024>}, {transform_indices = @transform_1, window_bounds = array<i64: 2, 4, 1024>}]} {
    %c0 = arith.constant 0 : index
    %c0_0 = arith.constant 0 : index
    %c0_1 = arith.constant 0 : index
    %0 = vector.load %arg2[%c0, %c0_0, %c0_1] : memref<2x8x1024xf32, #tpu.memory_space<vmem>>, vector<2x1x1024xf32>
    %1 = vector.shape_cast %0 : vector<2x1x1024xf32> to vector<2x1024xf32>
    %c0_2 = arith.constant 0 : index
    %c1 = arith.constant 1 : index
    %c0_3 = arith.constant 0 : index
    %2 = vector.load %arg2[%c0_2, %c1, %c0_3] : memref<2x8x1024xf32, #tpu.memory_space<vmem>>, vector<2x1x1024xf32>
    %3 = vector.shape_cast %2 : vector<2x1x1024xf32> to vector<2x1024xf32>
    %4 = arith.addf %1, %3 : vector<2x1024xf32>
    %cst = arith.constant 0.333333343 : f32
    %5 = vector.broadcast %cst : f32 to vector<2x1024xf32>
    %6 = arith.mulf %4, %5 : vector<2x1024xf32>
    %c0_4 = arith.constant 0 : index
    %c0_5 = arith.constant 0 : index
    %c0_6 = arith.constant 0 : index
    %7 = vector.load %arg3[%c0_4, %c0_5, %c0_6] : memref<2x4x1024xf32, #tpu.memory_space<vmem>>, vector<2x1x1024xf32>
    %8 = vector.shape_cast %7 : vector<2x1x1024xf32> to vector<2x1024xf32>
    %9 = vector.shape_cast %6 : vector<2x1024xf32> to vector<2x1x1024xf32>
    tpu.vector_store %arg3[%c0_4, %c0_5, %c0_6], %9 {strides = array<i32>} : memref<2x4x1024xf32, #tpu.memory_space<vmem>>, vector<2x1x1024xf32>,
    %c0_7 = arith.constant 0 : index
    %c1_8 = arith.constant 1 : index
    %c0_9 = arith.constant 0 : index
    %10 = vector.load %arg2[%c0_7, %c1_8, %c0_9] : memref<2x8x1024xf32, #tpu.memory_space<vmem>>, vector<2x1x1024xf32>
    %11 = vector.shape_cast %10 : vector<2x1x1024xf32> to vector<2x1024xf32>
    %c0_10 = arith.constant 0 : index
    %c2 = arith.constant 2 : index
    %c0_11 = arith.constant 0 : index
    %12 = vector.load %arg2[%c0_10, %c2, %c0_11] : memref<2x8x1024xf32, #tpu.memory_space<vmem>>, vector<2x1x1024xf32>
    %13 = vector.shape_cast %12 : vector<2x1x1024xf32> to vector<2x1024xf32>
    %14 = arith.addf %11, %13 : vector<2x1024xf32>
    %c0_12 = arith.constant 0 : index
    %c3 = arith.constant 3 : index
    %c0_13 = arith.constant 0 : index
    %15 = vector.load %arg2[%c0_12, %c3, %c0_13] : memref<2x8x1024xf32, #tpu.memory_space<vmem>>, vector<2x1x1024xf32>
    %16 = vector.shape_cast %15 : vector<2x1x1024xf32> to vector<2x1024xf32>
    %17 = arith.addf %14, %16 : vector<2x1024xf32>
    %cst_14 = arith.constant 0.333333343 : f32
    %18 = vector.broadcast %cst_14 : f32 to vector<2x1024xf32>
    %19 = arith.mulf %17, %18 : vector<2x1024xf32>
    %c0_15 = arith.constant 0 : index
    %c1_16 = arith.constant 1 : index
    %c0_17 = arith.constant 0 : index
    %20 = vector.load %arg3[%c0_15, %c1_16, %c0_17] : memref<2x4x1024xf32, #tpu.memory_space<vmem>>, vector<2x1x1024xf32>
    %21 = vector.shape_cast %20 : vector<2x1x1024xf32> to vector<2x1024xf32>
    %22 = vector.shape_cast %19 : vector<2x1024xf32> to vector<2x1x1024xf32>
    tpu.vector_store %arg3[%c0_15, %c1_16, %c0_17], %22 {strides = array<i32>} : memref<2x4x1024xf32, #tpu.memory_space<vmem>>, vector<2x1x1024xf32>,
    %c0_18 = arith.constant 0 : index
    %c3_19 = arith.constant 3 : index
    %c0_20 = arith.constant 0 : index
    %23 = vector.load %arg2[%c0_18, %c3_19, %c0_20] : memref<2x8x1024xf32, #tpu.memory_space<vmem>>, vector<2x1x1024xf32>
    %24 = vector.shape_cast %23 : vector<2x1x1024xf32> to vector<2x1024xf32>
    %c0_21 = arith.constant 0 : index
    %c4 = arith.constant 4 : index
    %c0_22 = arith.constant 0 : index
    %25 = vector.load %arg2[%c0_21, %c4, %c0_22] : memref<2x8x1024xf32, #tpu.memory_space<vmem>>, vector<2x1x1024xf32>
    %26 = vector.shape_cast %25 : vector<2x1x1024xf32> to vector<2x1024xf32>
    %27 = arith.addf %24, %26 : vector<2x1024xf32>
    %c0_23 = arith.constant 0 : index
    %c5 = arith.constant 5 : index
    %c0_24 = arith.constant 0 : index
    %28 = vector.load %arg2[%c0_23, %c5, %c0_24] : memref<2x8x1024xf32, #tpu.memory_space<vmem>>, vector<2x1x1024xf32>
    %29 = vector.shape_cast %28 : vector<2x1x1024xf32> to vector<2x1024xf32>
    %30 = arith.addf %27, %29 : vector<2x1024xf32>
    %cst_25 = arith.constant 0.333333343 : f32
    %31 = vector.broadcast %cst_25 : f32 to vector<2x1024xf32>
    %32 = arith.mulf %30, %31 : vector<2x1024xf32>
    %c0_26 = arith.constant 0 : index
    %c2_27 = arith.constant 2 : index
    %c0_28 = arith.constant 0 : index
    %33 = vector.load %arg3[%c0_26, %c2_27, %c0_28] : memref<2x4x1024xf32, #tpu.memory_space<vmem>>, vector<2x1x1024xf32>
    %34 = vector.shape_cast %33 : vector<2x1x1024xf32> to vector<2x1024xf32>
    %35 = vector.shape_cast %32 : vector<2x1024xf32> to vector<2x1x1024xf32>
    tpu.vector_store %arg3[%c0_26, %c2_27, %c0_28], %35 {strides = array<i32>} : memref<2x4x1024xf32, #tpu.memory_space<vmem>>, vector<2x1x1024xf32>,
    %c0_29 = arith.constant 0 : index
    %c5_30 = arith.constant 5 : index
    %c0_31 = arith.constant 0 : index
    %36 = vector.load %arg2[%c0_29, %c5_30, %c0_31] : memref<2x8x1024xf32, #tpu.memory_space<vmem>>, vector<2x1x1024xf32>
    %37 = vector.shape_cast %36 : vector<2x1x1024xf32> to vector<2x1024xf32>
    %c0_32 = arith.constant 0 : index
    %c6 = arith.constant 6 : index
    %c0_33 = arith.constant 0 : index
    %38 = vector.load %arg2[%c0_32, %c6, %c0_33] : memref<2x8x1024xf32, #tpu.memory_space<vmem>>, vector<2x1x1024xf32>
    %39 = vector.shape_cast %38 : vector<2x1x1024xf32> to vector<2x1024xf32>
    %40 = arith.addf %37, %39 : vector<2x1024xf32>
    %c0_34 = arith.constant 0 : index
    %c7 = arith.constant 7 : index
    %c0_35 = arith.constant 0 : index
    %41 = vector.load %arg2[%c0_34, %c7, %c0_35] : memref<2x8x1024xf32, #tpu.memory_space<vmem>>, vector<2x1x1024xf32>
    %42 = vector.shape_cast %41 : vector<2x1x1024xf32> to vector<2x1024xf32>
    %43 = arith.addf %40, %42 : vector<2x1024xf32>
    %cst_36 = arith.constant 0.333333343 : f32
    %44 = vector.broadcast %cst_36 : f32 to vector<2x1024xf32>
    %45 = arith.mulf %43, %44 : vector<2x1024xf32>
    %c0_37 = arith.constant 0 : index
    %c3_38 = arith.constant 3 : index
    %c0_39 = arith.constant 0 : index
    %46 = vector.load %arg3[%c0_37, %c3_38, %c0_39] : memref<2x4x1024xf32, #tpu.memory_space<vmem>>, vector<2x1x1024xf32>
    %47 = vector.shape_cast %46 : vector<2x1x1024xf32> to vector<2x1024xf32>
    %48 = vector.shape_cast %45 : vector<2x1024xf32> to vector<2x1x1024xf32>
    tpu.vector_store %arg3[%c0_37, %c3_38, %c0_39], %48 {strides = array<i32>} : memref<2x4x1024xf32, #tpu.memory_space<vmem>>, vector<2x1x1024xf32>,
    return
  }
  func.func @transform_0(%arg0: i32, %arg1: i32) -> (i32, i32, i32) {
    %c0_i32 = arith.constant 0 : i32
    %c0_i32_0 = arith.constant 0 : i32
    return %arg0, %c0_i32, %arg1 : i32, i32, i32
  }
  func.func @transform_1(%arg0: i32, %arg1: i32) -> (i32, i32, i32) {
    %c0_i32 = arith.constant 0 : i32
    %c0_i32_0 = arith.constant 0 : i32
    return %arg0, %c0_i32, %arg1 : i32, i32, i32
  }
}

</mosaic_0001>

<bundles_post_ra>
// kernel: temporal_pooling.1
= control target key start
LH: loop header
LB: loop body
LE: loop exit
PB: predicated region body
PF: predicated region fallthrough
CT: control target
= control target key end

     0   :  { %s345_s0 = inlined_call_operand.vmem [shape: f32[2,8,1024], index: 0, kind: input, shape index: {}]   ;;  %s346_s1 = inlined_call_operand.vmem [shape: f32[2,4,1024], index: 1, kind: output, shape index: {}]  }
   0x1   :  { %v8_v0 = vld [vmem:[%s345_s0] ss:$8 sm:$0xf]  ;;  %v132_v3 = vld [vmem:[%s345_s0 + $0x1] ss:$8 sm:$0xf] }
   0x2   :  { %v9_v1 = vld [vmem:[%s345_s0] ss:$8 sm:$0xf0]  ;;  %v133_v4 = vld [vmem:[%s345_s0 + $0x1] ss:$8 sm:$0xf0] }
   0x3   :  { %v10_v2 = vor.u32 %v9_v1, %v8_v0  ;;  %v18_v5 = vor.u32 %v133_v4, %v132_v3  ;;  %v130_v6 = vld [vmem:[%s345_s0 + $0x40] ss:$8 sm:$0xf]  ;;  %v134_v9 = vld [vmem:[%s345_s0 + $0x41] ss:$8 sm:$0xf] }
   0x4   :  { %v131_v7 = vld [vmem:[%s345_s0 + $0x40] ss:$8 sm:$0xf0]  ;;  %v135_v10 = vld [vmem:[%s345_s0 + $0x41] ss:$8 sm:$0xf0] }
   0x5   :  { %v14_v8 = vor.u32 %v131_v7, %v130_v6  ;;  %v23_v11 = vadd.f32 %v18_v5, %v10_v2  ;;  %v22_v12 = vor.u32 %v135_v10, %v134_v9  ;;  %v137_v13 = vld [vmem:[%s345_s0 + $0x1] ss:$8 sm:$0xf]  ;;  %v141_v16 = vld [vmem:[%s345_s0 + $0x2] ss:$8 sm:$0xf] }
   0x6   :  { %v138_v14 = vld [vmem:[%s345_s0 + $0x1] ss:$8 sm:$0xf0]  ;;  %v142_v17 = vld [vmem:[%s345_s0 + $0x2] ss:$8 sm:$0xf0] }
   0x7   :  { %v32_v15 = vor.u32 %v138_v14, %v137_v13  ;;  %v25_v18 = vmul.f32 0.33333334, %v23_v11  ;;  %v24_v19 = vadd.f32 %v22_v12, %v14_v8  ;;  %v39_v20 = vor.u32 %v142_v17, %v141_v16  ;;  %v145_v21 = vld [vmem:[%s345_s0 + $0x3] ss:$8 sm:$0xf] }
   0x8   :  { %v146_v22 = vld [vmem:[%s345_s0 + $0x3] ss:$8 sm:$0xf0]  ;;  %v139_v23 = vld [vmem:[%s345_s0 + $0x41] ss:$8 sm:$0xf] }
   0x9   :  { %27 = vst [vmem:[%s346_s1] ss:$4 sm:$0xff] %v25_v18  ;;  %v26_v24 = vmul.f32 0.33333334, %v24_v19  ;;  %v44_v25 = vadd.f32 %v39_v20, %v32_v15  ;;  %v49_v26 = vor.u32 %v146_v22, %v145_v21  ;;  %v140_v27 = vld [vmem:[%s345_s0 + $0x41] ss:$8 sm:$0xf0] }
   0xa   :  { %v35_v28 = vor.u32 %v140_v27, %v139_v23  ;;  %v143_v29 = vld [vmem:[%s345_s0 + $0x42] ss:$8 sm:$0xf]  ;;  %v147_v33 = vld [vmem:[%s345_s0 + $0x43] ss:$8 sm:$0xf] }
   0xb   :  { %v144_v30 = vld [vmem:[%s345_s0 + $0x42] ss:$8 sm:$0xf0]  ;;  %136 = vst [vmem:[%s346_s1 + $0x20] ss:$4 sm:$0xff] %v26_v24  ;;  %v54_v31 = vadd.f32 %v49_v26, %v44_v25 }
   0xc   :  { %v43_v32 = vor.u32 %v144_v30, %v143_v29  ;;  %v148_v34 = vld [vmem:[%s345_s0 + $0x43] ss:$8 sm:$0xf0]  ;;  %v155_v41 = vld [vmem:[%s345_s0 + $0x4] ss:$8 sm:$0xf] }
   0xd   :  { %v151_v35 = vld [vmem:[%s345_s0 + $0x3] ss:$8 sm:$0xf]  ;;  %v56_v36 = vmul.f32 0.33333334, %v54_v31  ;;  %v53_v38 = vor.u32 %v148_v34, %v147_v33 }
   0xe   :  { %v45_v37 = vadd.f32 %v43_v32, %v35_v28  ;;  %v152_v39 = vld [vmem:[%s345_s0 + $0x3] ss:$8 sm:$0xf0]  ;;  %v156_v42 = vld [vmem:[%s345_s0 + $0x4] ss:$8 sm:$0xf0] }
   0xf   :  { %v64_v40 = vor.u32 %v152_v39, %v151_v35  ;;  %149 = vst [vmem:[%s346_s1 + $0x1] ss:$4 sm:$0xff] %v56_v36  ;;  %v71_v44 = vor.u32 %v156_v42, %v155_v41  ;;  %v159_v45 = vld [vmem:[%s345_s0 + $0x5] ss:$8 sm:$0xf] }
  0x10   :  { %v55_v43 = vadd.f32 %v53_v38, %v45_v37  ;;  %v160_v46 = vld [vmem:[%s345_s0 + $0x5] ss:$8 sm:$0xf0]  ;;  %v153_v47 = vld [vmem:[%s345_s0 + $0x43] ss:$8 sm:$0xf] }
  0x11   :  { %v76_v49 = vadd.f32 %v71_v44, %v64_v40  ;;  %v81_v50 = vor.u32 %v160_v46, %v159_v45  ;;  %v154_v51 = vld [vmem:[%s345_s0 + $0x43] ss:$8 sm:$0xf0]  ;;  %v157_v53 = vld [vmem:[%s345_s0 + $0x44] ss:$8 sm:$0xf] }
  0x12   :  { %v57_v48 = vmul.f32 0.33333334, %v55_v43  ;;  %v67_v52 = vor.u32 %v154_v51, %v153_v47  ;;  %v158_v54 = vld [vmem:[%s345_s0 + $0x44] ss:$8 sm:$0xf0] }
  0x13   :  { %v86_v55 = vadd.f32 %v81_v50, %v76_v49  ;;  %v75_v56 = vor.u32 %v158_v54, %v157_v53  ;;  %v161_v57 = vld [vmem:[%s345_s0 + $0x45] ss:$8 sm:$0xf]  ;;  %v169_v1 = vld [vmem:[%s345_s0 + $0x6] ss:$8 sm:$0xf] }
  0x14   :  { %150 = vst [vmem:[%s346_s1 + $0x21] ss:$4 sm:$0xff] %v57_v48  ;;  %v162_v58 = vld [vmem:[%s345_s0 + $0x45] ss:$8 sm:$0xf0] }
  0x15   :  { %v165_v59 = vld [vmem:[%s345_s0 + $0x5] ss:$8 sm:$0xf]  ;;  %v88_v60 = vmul.f32 0.33333334, %v86_v55  ;;  %v77_v61 = vadd.f32 %v75_v56, %v67_v52  ;;  %v85_v62 = vor.u32 %v162_v58, %v161_v57 }
  0x16   :  { %v166_v63 = vld [vmem:[%s345_s0 + $0x5] ss:$8 sm:$0xf0]  ;;  %v170_v2 = vld [vmem:[%s345_s0 + $0x6] ss:$8 sm:$0xf0] }
  0x17   :  { %v96_v0 = vor.u32 %v166_v63, %v165_v59  ;;  %163 = vst [vmem:[%s346_s1 + $0x2] ss:$4 sm:$0xff] %v88_v60  ;;  %v87_v3 = vadd.f32 %v85_v62, %v77_v61  ;;  %v103_v4 = vor.u32 %v170_v2, %v169_v1  ;;  %v173_v5 = vld [vmem:[%s345_s0 + $0x7] ss:$8 sm:$0xf] }
  0x18   :  { %v174_v6 = vld [vmem:[%s345_s0 + $0x7] ss:$8 sm:$0xf0]  ;;  %v167_v7 = vld [vmem:[%s345_s0 + $0x45] ss:$8 sm:$0xf] }
  0x19   :  { %v89_v8 = vmul.f32 0.33333334, %v87_v3  ;;  %v108_v9 = vadd.f32 %v103_v4, %v96_v0  ;;  %v113_v10 = vor.u32 %v174_v6, %v173_v5  ;;  %v168_v11 = vld [vmem:[%s345_s0 + $0x45] ss:$8 sm:$0xf0] }
  0x1a   :  { %v99_v12 = vor.u32 %v168_v11, %v167_v7  ;;  %v171_v13 = vld [vmem:[%s345_s0 + $0x46] ss:$8 sm:$0xf]  ;;  %v175_v17 = vld [vmem:[%s345_s0 + $0x47] ss:$8 sm:$0xf] }
  0x1b   :  { %v172_v14 = vld [vmem:[%s345_s0 + $0x46] ss:$8 sm:$0xf0]  ;;  %164 = vst [vmem:[%s346_s1 + $0x22] ss:$4 sm:$0xff] %v89_v8  ;;  %v118_v15 = vadd.f32 %v113_v10, %v108_v9 }
  0x1c   :  { %v107_v16 = vor.u32 %v172_v14, %v171_v13  ;;  %v176_v18 = vld [vmem:[%s345_s0 + $0x47] ss:$8 sm:$0xf0] }
  0x1d   :  { %v120_v19 = vmul.f32 0.33333334, %v118_v15  ;;  %v117_v21 = vor.u32 %v176_v18, %v175_v17 }
  0x1e   :  { %v109_v20 = vadd.f32 %v107_v16, %v99_v12 }
  0x1f   :  { %177 = vst [vmem:[%s346_s1 + $0x3] ss:$4 sm:$0xff] %v120_v19 }
  0x20   :  { %v119_v22 = vadd.f32 %v117_v21, %v109_v20 }
  0x22   :  { %v121_v23 = vmul.f32 0.33333334, %v119_v22 }
  0x24   :  { %178 = vst [vmem:[%s346_s1 + $0x23] ss:$4 sm:$0xff] %v121_v23 }

</bundles_post_ra>
